<compile_context>
chip_gen: v5e
topology: v5e:2x2
jax: 0.10.0
libtpu: 0.0.40
codegen_flags: <defaults>
</compile_context>

<pallas_src>
import functools
import math

import jax
import jax.numpy as jnp
from jax import lax
from jax.experimental import pallas as pl
from jax.experimental.pallas import tpu as pltpu

# ----------------------------------------------------------------------------
# Module "parameters" (set in __init__ in the PyTorch version).
# ----------------------------------------------------------------------------
LAMS = (0.7, 0.3)

_LANES = 128                    # lane-dense slab width (lane dimension)
_SUBLANES = 8                   # f32 vreg sublane count
_CHUNK = 256                    # rows per in-kernel accumulation chunk (mult of 8)
_MAX_BLOCK_BYTES = 5 << 20      # ~5 MiB per input block (x 3 inputs x 2 buffers)
_VMEM_LIMIT_BYTES = 48 << 20    # explicit scoped-VMEM limit (safe on v5e/v6e/v7x)
_NUM_CORES = 2                  # leading "parallel" axis for the v7x 2-TC split


def _round_up(x, m):
    return (x + m - 1) // m * m


def _cdiv(a, b):
    return -(-a // b)


def _regularized_kernel(o_ref, l_ref, v_ref, res_ref, acc_ref, *,
                        lam0, lam1, inv_total, m_rows, tile_m, chunk,
                        tiles_per_core, num_tiles):
    c = pl.program_id(0)                       # core-split index ("parallel")
    i = pl.program_id(1)                       # row-tile index  ("arbitrary")
    t = c * tiles_per_core + i                 # global (unclamped) tile index
    row_base = t * tile_m

    # Init this core's fused accumulator on its first row tile.
    @pl.when(i == 0)
    def _init():
        acc_ref[...] = jnp.zeros_like(acc_ref)

    n_chunks = tile_m // chunk
    # Hoisted once per tile (JAX does not CSE broadcast_in_dim inside the loop).
    local_rows = lax.broadcasted_iota(jnp.int32, (chunk, _LANES), 0)

    def body(k, carry):
        start = pl.multiple_of(k * chunk, chunk)
        # Cast in-kernel; VPU slot is free in this DMA-bound kernel.
        o = o_ref[pl.ds(start, chunk), :].astype(jnp.float32)
        l = l_ref[pl.ds(start, chunk), :].astype(jnp.float32)
        v = v_ref[pl.ds(start, chunk), :].astype(jnp.float32)
        d = o - l
        # Fused per-element contribution: lam0 * d^2 + lam1 * v * |d|.
        part = lam0 * (d * d) + lam1 * (v * jnp.abs(d))
        # Mask rows beyond the true row count (ragged last tile / clamped
        # overflow tiles read undefined or duplicated data -> contribute 0).
        rows = row_base + start + local_rows
        part = jnp.where(rows < m_rows, part, 0.0)
        # Fold the chunk into the vreg-shaped accumulator with full-vreg adds.
        acc_ref[...] += jnp.sum(part.reshape(chunk // _SUBLANES, _SUBLANES, _LANES),
                                axis=0)
        return carry

    lax.fori_loop(0, n_chunks, body, 0)

    # Finalize on this core's last tile: one cross-lane/sublane reduce + scale.
    @pl.when(i == pl.num_programs(1) - 1)
    def _finalize():
        res_ref[...] = jnp.sum(acc_ref[...], keepdims=True) * inv_total


def regularized_loss(outputs, labels, valuations, lams=LAMS):
    """Pallas implementation of Regularized([MSE, valuation-weighted L1])."""
    assert outputs.ndim == labels.ndim, "outputs/labels rank mismatch"
    assert outputs.shape == labels.shape == valuations.shape, "shape mismatch"

    total = math.prod(outputs.shape)
    itemsize = max(jnp.dtype(a.dtype).itemsize
                   for a in (outputs, labels, valuations))

    # Flatten to a contiguous, lane-dense (m_rows, 128) slab.
    padded_total = _round_up(total, _LANES)
    m_rows = padded_total // _LANES
    if m_rows < _SUBLANES:                      # tiny inputs: pad to one vreg row-group
        m_rows = _SUBLANES
        padded_total = m_rows * _LANES
    pad_elems = padded_total - total

    # Dtype-aware row cap: same DMA bytes per block regardless of input dtype.
    cap_rows = max(_CHUNK,
                   (_MAX_BLOCK_BYTES // (_LANES * itemsize)) // _CHUNK * _CHUNK)

    if m_rows >= _CHUNK:
        chunk = _CHUNK
        tile_m = min(cap_rows, (m_rows // _CHUNK) * _CHUNK)
    else:
        # Small inputs: one tile, one chunk (multiple of 8; remainder masked).
        tile_m = chunk = (m_rows // _SUBLANES) * _SUBLANES

    num_tiles = _cdiv(m_rows, tile_m)
    n_cores = _NUM_CORES if num_tiles > 1 else 1
    tiles_per_core = _cdiv(num_tiles, n_cores)

    def to_slab(x):
        flat = x.reshape(-1)                    # contiguous reshape: no copy
        if pad_elems:
            # TODO(synk): only hit when total % 128 != 0 or total < 1024;
            # this fallback makes a full HBM copy (pads contribute exactly 0).
            flat = jnp.pad(flat, (0, pad_elems))
        return flat.reshape(m_rows, _LANES)

    o2 = to_slab(outputs)
    l2 = to_slab(labels)
    v2 = to_slab(valuations)

    kernel = functools.partial(
        _regularized_kernel,
        lam0=float(lams[0]), lam1=float(lams[1]),
        inv_total=1.0 / float(total),
        m_rows=m_rows, tile_m=tile_m, chunk=chunk,
        tiles_per_core=tiles_per_core, num_tiles=num_tiles)

    # Clamp overflow tiles (uneven core split) to the last valid block; the
    # kernel fully masks them via the global row index.
    def in_map(c, i):
        return (jnp.minimum(c * tiles_per_core + i, num_tiles - 1), 0)

    in_spec = pl.BlockSpec((tile_m, _LANES), in_map)

    res = pl.pallas_call(
        kernel,
        out_shape=jax.ShapeDtypeStruct((n_cores, 1), jnp.float32),
        grid_spec=pltpu.PrefetchScalarGridSpec(
            num_scalar_prefetch=0,
            grid=(n_cores, tiles_per_core),
            in_specs=[in_spec, in_spec, in_spec],
            out_specs=pl.BlockSpec((1, 1), lambda c, i: (c, 0)),
            scratch_shapes=[
                pltpu.VMEM((_SUBLANES, _LANES), jnp.float32),  # per-core accumulator
            ],
        ),
        compiler_params=pltpu.CompilerParams(
            dimension_semantics=("parallel", "arbitrary"),
            vmem_limit_bytes=_VMEM_LIMIT_BYTES),
    )(o2, l2, v2)

    # Sum the per-core partials (n_cores <= 2; trivial).
    return jnp.sum(res)


def regularized_loss_ref(outputs, labels, valuations, lams=LAMS):
    o = outputs.astype(jnp.float32)
    l = labels.astype(jnp.float32)
    v = valuations.astype(jnp.float32)
    mse = jnp.mean((o - l) ** 2)
    wl1 = jnp.mean(v * jnp.abs(o - l))
    return lams[0] * mse + lams[1] * wl1


if __name__ == "__main__":
    key = jax.random.PRNGKey(0)
    k0, k1, k2 = jax.random.split(key, 3)

    # Small NCHW-style shapes consistent with an allocation-loss module.
    B, A, H, W = 2, 4, 16, 16
    outputs = jax.random.normal(k0, (B, A, H, W), dtype=jnp.float32)
    labels = jax.random.normal(k1, (B, A, H, W), dtype=jnp.float32)
    valuations = jax.random.uniform(k2, (B, A, H, W), dtype=jnp.float32)

    out = regularized_loss(outputs, labels, valuations)
    out = jax.block_until_ready(out)

    ref = regularized_loss_ref(outputs, labels, valuations)
    assert jnp.allclose(out, ref, rtol=1e-5, atol=1e-6), (out, ref)

    print("KERNEL_OK")
</pallas_src>

<mosaic_0001>
module attributes {stable_mosaic.version = 11 : i64} {
  func.func @_regularized_kernel(%arg0: i32, %arg1: i32, %arg2: memref<16x128xf32, #tpu.memory_space<vmem>>, %arg3: memref<16x128xf32, #tpu.memory_space<vmem>>, %arg4: memref<16x128xf32, #tpu.memory_space<vmem>>, %arg5: memref<1x1xf32, #tpu.memory_space<vmem>>, %arg6: memref<8x128xf32, #tpu.memory_space<vmem>>) attributes {dimension_semantics = [#tpu.dimension_semantics<parallel>, #tpu.dimension_semantics<arbitrary>], iteration_bounds = array<i64: 1, 1>, scalar_prefetch = 0 : i64, scratch_operands = 1 : i64, tpu.core_type = #tpu.core_type<tc>, window_params = [{transform_indices = @transform_0, window_bounds = array<i64: 16, 128>}, {transform_indices = @transform_1, window_bounds = array<i64: 16, 128>}, {transform_indices = @transform_2, window_bounds = array<i64: 16, 128>}, {transform_indices = @transform_3, window_bounds = array<i64: 1, 1>}]} {
    %c1_i32 = arith.constant 1 : i32
    %0 = arith.muli %arg0, %c1_i32 : i32
    %1 = arith.addi %0, %arg1 : i32
    %c16_i32 = arith.constant 16 : i32
    %2 = arith.muli %1, %c16_i32 : i32
    %c0_i32 = arith.constant 0 : i32
    %3 = arith.cmpi eq, %arg1, %c0_i32 : i32
    %4 = arith.extui %3 : i1 to i32
    %c0_i32_0 = arith.constant 0 : i32
    %5 = arith.cmpi ne, %4, %c0_i32_0 : i32
    scf.if %5 {
      %cst_16 = arith.constant 0.000000e+00 : f32
      %39 = vector.broadcast %cst_16 : f32 to vector<8x128xf32>
      %c0_17 = arith.constant 0 : index
      %c0_18 = arith.constant 0 : index
      %40 = vector.load %arg6[%c0_17, %c0_18] : memref<8x128xf32, #tpu.memory_space<vmem>>, vector<8x128xf32>
      tpu.vector_store %arg6[%c0_17, %c0_18], %39 {strides = array<i32>} : memref<8x128xf32, #tpu.memory_space<vmem>>, vector<8x128xf32>,
    } else {
    }
    %6 = tpu.iota {dimensions = array<i32: 0>} : vector<16x128xi32>
    %c0_i32_1 = arith.constant 0 : i32
    %c16_i32_2 = arith.constant 16 : i32
    %7 = arith.muli %c0_i32_1, %c16_i32_2 : i32
    %8 = tpu.assume_multiple %7, 16 : i32
    %9 = arith.index_cast %8 : i32 to index
    %c0 = arith.constant 0 : index
    %10 = vector.load %arg2[%9, %c0] : memref<16x128xf32, #tpu.memory_space<vmem>>, vector<16x128xf32>
    %11 = arith.index_cast %8 : i32 to index
    %c0_3 = arith.constant 0 : index
    %12 = vector.load %arg3[%11, %c0_3] : memref<16x128xf32, #tpu.memory_space<vmem>>, vector<16x128xf32>
    %13 = arith.index_cast %8 : i32 to index
    %c0_4 = arith.constant 0 : index
    %14 = vector.load %arg4[%13, %c0_4] : memref<16x128xf32, #tpu.memory_space<vmem>>, vector<16x128xf32>
    %15 = arith.subf %10, %12 : vector<16x128xf32>
    %16 = arith.mulf %15, %15 : vector<16x128xf32>
    %cst = arith.constant 0.699999988 : f32
    %17 = vector.broadcast %cst : f32 to vector<16x128xf32>
    %18 = arith.mulf %17, %16 : vector<16x128xf32>
    %19 = math.absf %15 : vector<16x128xf32>
    %20 = arith.mulf %14, %19 : vector<16x128xf32>
    %cst_5 = arith.constant 3.000000e-01 : f32
    %21 = vector.broadcast %cst_5 : f32 to vector<16x128xf32>
    %22 = arith.mulf %21, %20 : vector<16x128xf32>
    %23 = arith.addf %18, %22 : vector<16x128xf32>
    %24 = arith.addi %2, %8 : i32
    %25 = vector.broadcast %24 : i32 to vector<16x128xi32>
    %26 = arith.addi %25, %6 : vector<16x128xi32>
    %c16_i32_6 = arith.constant 16 : i32
    %27 = vector.broadcast %c16_i32_6 : i32 to vector<16x128xi32>
    %28 = arith.cmpi slt, %26, %27 : vector<16x128xi32>
    %cst_7 = arith.constant 0.000000e+00 : f32
    %29 = vector.broadcast %cst_7 : f32 to vector<16x128xf32>
    %30 = arith.select %28, %23, %29 : vector<16x128xi1>, vector<16x128xf32>
    %c0_8 = arith.constant 0 : index
    %c0_9 = arith.constant 0 : index
    %31 = vector.load %arg6[%c0_8, %c0_9] : memref<8x128xf32, #tpu.memory_space<vmem>>, vector<8x128xf32>
    %32 = vector.shape_cast %30 : vector<16x128xf32> to vector<2x8x128xf32>
    %cst_10 = arith.constant dense<0.000000e+00> : vector<8x128xf32>
    %33 = vector.multi_reduction <add>, %32, %cst_10 [0] : vector<2x8x128xf32> to vector<8x128xf32>
    %34 = arith.addf %31, %33 : vector<8x128xf32>
    %c0_11 = arith.constant 0 : index
    %c0_12 = arith.constant 0 : index
    %35 = vector.load %arg6[%c0_11, %c0_12] : memref<8x128xf32, #tpu.memory_space<vmem>>, vector<8x128xf32>
    tpu.vector_store %arg6[%c0_11, %c0_12], %34 {strides = array<i32>} : memref<8x128xf32, #tpu.memory_space<vmem>>, vector<8x128xf32>,
    %c1_i32_13 = arith.constant 1 : i32
    %c0_i32_14 = arith.constant 0 : i32
    %36 = arith.cmpi eq, %arg1, %c0_i32_14 : i32
    %37 = arith.extui %36 : i1 to i32
    %c0_i32_15 = arith.constant 0 : i32
    %38 = arith.cmpi ne, %37, %c0_i32_15 : i32
    scf.if %38 {
      %c0_16 = arith.constant 0 : index
      %c0_17 = arith.constant 0 : index
      %39 = vector.load %arg6[%c0_16, %c0_17] : memref<8x128xf32, #tpu.memory_space<vmem>>, vector<8x128xf32>
      %40 = vector.shape_cast %39 : vector<8x128xf32> to vector<1x8x128xf32>
      %cst_18 = arith.constant dense<0.000000e+00> : vector<1xf32>
      %41 = vector.multi_reduction <add>, %40, %cst_18 [1, 2] : vector<1x8x128xf32> to vector<1xf32>
      %42 = vector.shape_cast %41 : vector<1xf32> to vector<1x1x1xf32>
      %43 = vector.extract %42[0, 0, 0] : f32 from vector<1x1x1xf32>
      %44 = vector.broadcast %43 : f32 to vector<1x1xf32>
      %cst_19 = arith.constant 4.8828125E-4 : f32
      %45 = vector.broadcast %cst_19 : f32 to vector<1x1xf32>
      %46 = arith.mulf %44, %45 : vector<1x1xf32>
      %c0_20 = arith.constant 0 : index
      %c0_21 = arith.constant 0 : index
      %47 = vector.load %arg5[%c0_20, %c0_21] : memref<1x1xf32, #tpu.memory_space<vmem>>, vector<1x1xf32>
      tpu.vector_store %arg5[%c0_20, %c0_21], %46 {strides = array<i32>} : memref<1x1xf32, #tpu.memory_space<vmem>>, vector<1x1xf32>,
    } else {
    }
    return
  }
  func.func @transform_0(%arg0: i32, %arg1: i32) -> (i32, i32) {
    %c1_i32 = arith.constant 1 : i32
    %0 = arith.muli %arg0, %c1_i32 : i32
    %1 = arith.addi %0, %arg1 : i32
    %c0_i32 = arith.constant 0 : i32
    %2 = arith.minsi %1, %c0_i32 : i32
    %c0_i32_0 = arith.constant 0 : i32
    %c0_i32_1 = arith.constant 0 : i32
    return %2, %c0_i32_0 : i32, i32
  }
  func.func @transform_1(%arg0: i32, %arg1: i32) -> (i32, i32) {
    %c1_i32 = arith.constant 1 : i32
    %0 = arith.muli %arg0, %c1_i32 : i32
    %1 = arith.addi %0, %arg1 : i32
    %c0_i32 = arith.constant 0 : i32
    %2 = arith.minsi %1, %c0_i32 : i32
    %c0_i32_0 = arith.constant 0 : i32
    %c0_i32_1 = arith.constant 0 : i32
    return %2, %c0_i32_0 : i32, i32
  }
  func.func @transform_2(%arg0: i32, %arg1: i32) -> (i32, i32) {
    %c1_i32 = arith.constant 1 : i32
    %0 = arith.muli %arg0, %c1_i32 : i32
    %1 = arith.addi %0, %arg1 : i32
    %c0_i32 = arith.constant 0 : i32
    %2 = arith.minsi %1, %c0_i32 : i32
    %c0_i32_0 = arith.constant 0 : i32
    %c0_i32_1 = arith.constant 0 : i32
    return %2, %c0_i32_0 : i32, i32
  }
  func.func @transform_3(%arg0: i32, %arg1: i32) -> (i32, i32) {
    %c0_i32 = arith.constant 0 : i32
    %c0_i32_0 = arith.constant 0 : i32
    return %arg0, %c0_i32 : i32, i32
  }
}

</mosaic_0001>

<bundles_post_ra>
// kernel: tpu_custom_call.1
= control target key start
LH: loop header
LB: loop body
LE: loop exit
PB: predicated region body
PF: predicated region fallthrough
CT: control target
= control target key end

     0   :  { %8 = vsyncpa [#allocation4], 0  ;;  %s323_s0 = inlined_call_operand.hbm [shape: f32[16,128], index: 0, kind: input, shape index: {}]   ;;  %s324_s1 = inlined_call_operand.hbm [shape: f32[16,128], index: 1, kind: input, shape index: {}]   ;;  %s325_s2 = inlined_call_operand.hbm [shape: f32[16,128], index: 2, kind: input, shape index: {}]   ;;  %s326_s3 = inlined_call_operand.hbm [shape: f32[1,1], index: 3, kind: output, shape index: {}]  }
   0x1   :  { %9 = vsyncpa [#allocation7], 0 }
   0x2   :  { %10 = vsyncpa [#allocation5], 0  ;;  %s40_s14 = sshll.u32 %s324_s1, 4  ;;  %s285_s15 = smov [#allocation6]   ;;  %s41_s14 = int_to_ptr.hbm [resolvable:$true] %s40_s14 }
   0x3   :  { %s42_s16 = sshll.u32 %s285_s15, 4  ;;  %s21_s19 = sshll.u32 %s323_s0, 4  ;;  %s43_s16 = int_to_ptr.vmem [resolvable:$true] %s42_s16  ;;  %s22_s19 = int_to_ptr.hbm [resolvable:$true] %s21_s19 }
   0x4   :  { %s286_s20 = smov 128   ;;  %s287_s21 = smov 8  }
   0x5   :  { %48 = dma.hbm_to_vmem [thread:$0]  %s41_s14, 256, %s43_s16, [#allocation7], %s286_s20, %s286_s20, %s287_s21  }
   0x6   :  { %s288_s22 = smov [#allocation3]   ;;  %s59_s26 = sshll.u32 %s325_s2, 4  ;;  %s60_s26 = int_to_ptr.hbm [resolvable:$true] %s59_s26 }
   0x7   :  { %s23_s23 = sshll.u32 %s288_s22, 4  ;;  %s289_s1 = smov [#allocation8]   ;;  %s24_s23 = int_to_ptr.vmem [resolvable:$true] %s23_s23 }
   0x8   :  { %29 = dma.hbm_to_vmem [thread:$0]  %s22_s19, 256, %s24_s23, [#allocation4], %s286_s20, %s286_s20, %s287_s21  }
   0x9   :  { %s61_s27 = sshll.u32 %s289_s1, 4  ;;  %s62_s27 = int_to_ptr.vmem [resolvable:$true] %s61_s27 }
   0xa   :  { %67 = dma.hbm_to_vmem [thread:$0]  %s60_s26, 256, %s62_s27, [#allocation7], %s286_s20, %s286_s20, %s287_s21  }
   0xb   :  { %279 = dma.done.wait [#allocation4], 256  }
   0xc   :  { %280 = vsyncadd [#allocation4], 4294967040 }
   0xd   :  { %281 = dma.done.wait [#allocation7], 512  }
   0xe   :  { %282 = vsyncadd [#allocation7], 4294966784  ;;  %v102_v0 = vld [vmem:[#allocation3] sm:$0xff]  ;;  %v103_v1 = vld [vmem:[#allocation3 + $0x8] sm:$0xff]  ;;  %s290_s0 = smov [#allocation9]   ;;  %s158_s30 = sshll.u32 %s326_s3, 4  ;;  %s159_s30 = int_to_ptr.hbm [resolvable:$true] %s158_s30 }
   0xf   :  { %v104_v2 = vld [vmem:[#allocation6] sm:$0xff]  ;;  %v105_v3 = vld [vmem:[#allocation6 + $0x8] sm:$0xff]  ;;  %v106_v5 = vld [vmem:[#allocation8] sm:$0xff]  ;;  %s156_s2 = sshll.u32 %s290_s0, 4  ;;  %vm149_vm0 = vcmask 0   ;;  %s157_s2 = int_to_ptr.vmem [resolvable:$true] %s156_s2 }
  0x10   :  { %v108_v4 = vsub.f32 %v102_v0, %v104_v2  ;;  %v109_v6 = vsub.f32 %v103_v1, %v105_v3  ;;  %v107_v7 = vld [vmem:[#allocation8 + $0x8] sm:$0xff] }
  0x12   :  { %v110_v8 = vmul.f32 %v108_v4, %v108_v4  ;;  %v114_v9 = vand.u32 2147483647, %v108_v4  ;;  %v111_v10 = vmul.f32 %v109_v6, %v109_v6  ;;  %v115_v11 = vand.u32 2147483647, %v109_v6 }
  0x14   :  { %v112_v12 = vmul.f32 0.7, %v110_v8  ;;  %v116_v13 = vmul.f32 %v114_v9, %v106_v5  ;;  %v113_v14 = vmul.f32 0.7, %v111_v10  ;;  %v117_v15 = vmul.f32 %v115_v11, %v107_v7 }
  0x16   :  { %v118_v16 = vmul.f32 0.3, %v116_v13  ;;  %v119_v17 = vmul.f32 0.3, %v117_v15 }
  0x18   :  { %v120_v18 = vadd.f32 %v118_v16, %v112_v12  ;;  %v121_v19 = vadd.f32 %v119_v17, %v113_v14 }
  0x1a   :  { %v131_v20 = vadd.f32 %v121_v19, %v120_v18 }
  0x1c   :  { %138 = vadd.xlane.f32.xlu0 %v131_v20 }
  0x8f   :  { %v139_v21 = vpop.xlane.xlu0 %138 }
  0x90   :  { %v140_v22 = vrot.slane %v139_v21, 4 }
  0x92   :  { %v141_v23 = vadd.f32 %v140_v22, %v139_v21 }
  0x94   :  { %v142_v24 = vrot.slane %v141_v23, 2 }
  0x96   :  { %v143_v25 = vadd.f32 %v142_v24, %v141_v23 }
  0x98   :  { %v144_v26 = vrot.slane %v143_v25, 1 }
  0x9a   :  { %v145_v27 = vadd.f32 %v144_v26, %v143_v25 }
  0x9c   :  { %175 = vpush %v145_v27 }
  0xcd   :  { %s176_s4 = spop %175 }
  0xce   :  { %v147_v28 = vstv %s176_s4 }
  0xcf   :  { %v148_v29 = vmul.f32 0.00048828125, %v147_v28 }
  0xd1   :  { %150 = vst.msk [vmem:[#allocation9] sm:$0x1] %vm149_vm0, %v148_v29 }
  0xd2   :  { %161 = dma.vmem_to_hbm [thread:$0]  %s157_s2, 16, %s159_s30, [#allocation5]  }
  0xd3   :  { %283 = dma.done.wait [#allocation5], 16  }
  0xd4   :  { %284 = vsyncadd [#allocation5], 4294967280 }
  0xd5   :  { %166 = vsyncpa [#allocation4], 1 }
  0xd6   :  { %167 = vsyncpa [#allocation7], 1 }
  0xd7   :  { %168 = vsyncpa [#allocation5], 1 }

</bundles_post_ra>
